<compile_context>
chip_gen: v7x
topology: tpu7x:2x2x1
jax: 0.10.0
libtpu: 0.0.40
codegen_flags: <defaults>
</compile_context>

<pallas_src>
import functools

import jax
import jax.numpy as jnp
import numpy as np
from jax.experimental import pallas as pl
from jax.experimental.pallas import tpu as pltpu


def _log_softmax(x, axis):
    m = jnp.max(x, axis=axis, keepdims=True)
    s = x - m
    return s - jnp.log(jnp.sum(jnp.exp(s), axis=axis, keepdims=True))


# ---------------------------------------------------------------------------
# Kernel 1: config-blended log-softmax tables (computed exactly once).
# ---------------------------------------------------------------------------
def _tables_kernel(cfg_ref, pAB_ref, pAtoB_ref, pBtoA_ref, w_ref, m_ref, *, N):
    cfg = cfg_ref[0]                                       # scalar from SMEM

    lpAB = _log_softmax(pAB_ref[...], axis=1)              # (2, N): rows = [lpA, lpB]
    w_ref[:, :N] = cfg * lpAB[0:1, :]                      # (1, N) lane window
    w_ref[:, N:] = (1.0 - cfg) * lpAB[1:2, :]

    # bigM = [[0, cfg*lpAtoB], [(1-cfg)*lpBtoA, 0]]  (2N, 2N)
    m_ref[...] = jnp.zeros_like(m_ref)
    m_ref[:N, N:] = cfg * _log_softmax(pAtoB_ref[...], axis=1)
    m_ref[N:, :N] = (1.0 - cfg) * _log_softmax(pBtoA_ref[...], axis=1)


# ---------------------------------------------------------------------------
# Kernel 2: batched log-prob, 1-D grid over batch tiles (hot loop).
# ---------------------------------------------------------------------------
def _logprob_kernel(s_ref, w_ref, m_ref, out_ref):
    s = s_ref[...]                                         # (tile_bs, 2N)

    # out[:,0] = sum_k s[b,k] * w[k]   (VPU mult + lane reduce)
    out_ref[:, 0:1] = jnp.sum(s * w_ref[...], axis=1, keepdims=True)

    # out[:,1] = sum_k (s @ bigM)[b,k] * s[b,k]   (one MXU matmul + VPU reduce)
    p = jnp.dot(s, m_ref[...], preferred_element_type=jnp.float32)
    out_ref[:, 1:2] = jnp.sum(p * s, axis=1, keepdims=True)


def _pick_tile_bs(bs, N, vmem_budget_bytes=12 * 1024 * 1024):
    """Largest batch tile (multiple of 8, <=512) fitting a conservative VMEM budget."""
    table_bytes = 2 * (4 * N * N + 2 * N) * 4        # resident bigM + w (x2 safety)
    per_row = 2 * (2 * N) * 4 + 2 * 2 * 4            # double-buffered sample + out row
    avail = max(vmem_budget_bytes - table_bytes, per_row * 8)
    tile = min(bs, 512, int(avail // per_row))
    if tile >= bs:
        return bs
    return max(8, (tile // 8) * 8)


@functools.partial(jax.jit, static_argnames=("tile_bs",))
def categorical_world_2var_forward(sample, config, pA, pB, pAtoB, pBtoA, tile_bs=None):
    """sample: (bs, 2N) f32, config: () f32 scalar -> (bs, 2) f32."""
    bs, twoN = sample.shape
    N = twoN // 2

    pAB = jnp.stack([pA, pB], axis=0)                 # (2, N): one small input
    cfg = jnp.asarray(config, jnp.float32).reshape(1)

    vmem = pl.BlockSpec(memory_space=pltpu.MemorySpace.VMEM)
    smem = pl.BlockSpec(memory_space=pltpu.MemorySpace.SMEM)

    # --- pass 1: blended tables (once per forward) ---
    wAB, bigM = pl.pallas_call(
        functools.partial(_tables_kernel, N=N),
        out_shape=(
            jax.ShapeDtypeStruct((1, 2 * N), jnp.float32),
            jax.ShapeDtypeStruct((2 * N, 2 * N), jnp.float32),
        ),
        in_specs=[smem, vmem, vmem, vmem],
        out_specs=(vmem, vmem),
    )(cfg, pAB, pAtoB, pBtoA)

    # --- pass 2: batched log-prob, gridded + pipelined over batch tiles ---
    if tile_bs is None:
        tile_bs = _pick_tile_bs(bs, N)
    grid = (pl.cdiv(bs, tile_bs),)

    out = pl.pallas_call(
        _logprob_kernel,
        out_shape=jax.ShapeDtypeStruct((bs, 2), jnp.float32),
        grid=grid,
        in_specs=[
            pl.BlockSpec((tile_bs, 2 * N), lambda i: (i, 0)),     # sample tile
            pl.BlockSpec((1, 2 * N), lambda i: (0, 0)),           # w       (resident)
            pl.BlockSpec((2 * N, 2 * N), lambda i: (0, 0)),       # bigM    (resident)
        ],
        out_specs=pl.BlockSpec((tile_bs, 2), lambda i: (i, 0)),
        compiler_params=pltpu.CompilerParams(
            dimension_semantics=("parallel",)),                   # megacore on v7x
    )(sample, wAB, bigM)
    return out


def _reference_logprob(sample, config, pA, pB, pAtoB, pBtoA):
    N = pA.shape[0]
    A = sample[:, :N]
    B = sample[:, N:]
    lpA = jax.nn.log_softmax(pA, axis=0)
    lpB = jax.nn.log_softmax(pB, axis=0)
    lpAtoB = jax.nn.log_softmax(pAtoB, axis=1)
    lpBtoA = jax.nn.log_softmax(pBtoA, axis=1)
    llA = jnp.einsum('i,bi->b', lpA, A)
    llB = jnp.einsum('j,bj->b', lpB, B)
    llAtoB = jnp.einsum('ij,bi,bj->b', lpAtoB, A, B)
    llBtoA = jnp.einsum('ji,bj,bi->b', lpBtoA, B, A)
    vAAtoB = jnp.stack([llA, llAtoB], axis=1)
    vBBtoA = jnp.stack([llB, llBtoA], axis=1)
    return config * vAAtoB + (1.0 - config) * vBBtoA


if __name__ == "__main__":
    key = jax.random.PRNGKey(0)
    N = 16    # number of categories
    bs = 32   # batch size (small, but enough to exercise a 4-step grid below)

    k_pA, k_pB, k_pAB, k_pBA, k_a, k_b, k_cfg = jax.random.split(key, 7)

    # deterministic parameter init, matching torch.nn.init.uniform_(-2, +2)
    pA = jax.random.uniform(k_pA, (N,), jnp.float32, -2.0, 2.0)
    pB = jax.random.uniform(k_pB, (N,), jnp.float32, -2.0, 2.0)
    pAtoB = jax.random.uniform(k_pAB, (N, N), jnp.float32, -2.0, 2.0)
    pBtoA = jax.random.uniform(k_pBA, (N, N), jnp.float32, -2.0, 2.0)

    # synthetic one-hot sample pair: (bs, 2N) = [A | B]
    a_idx = jax.random.randint(k_a, (bs,), 0, N)
    b_idx = jax.random.randint(k_b, (bs,), 0, N)
    A = jax.nn.one_hot(a_idx, N, dtype=jnp.float32)
    B = jax.nn.one_hot(b_idx, N, dtype=jnp.float32)
    sample = jnp.concatenate([A, B], axis=1)

    # sampled configuration (bernoulli, as in configiter), kept as float scalar
    config = jax.random.bernoulli(k_cfg, 0.5, ()).astype(jnp.float32)

    # 1) default tiling (single batch tile at this size)
    out = categorical_world_2var_forward(sample, config, pA, pB, pAtoB, pBtoA)
    out = jax.block_until_ready(out)
    ref = _reference_logprob(sample, config, pA, pB, pAtoB, pBtoA)
    np.testing.assert_allclose(np.asarray(out), np.asarray(ref), rtol=1e-5, atol=1e-5)

    # 2) forced small tiles: exercises the 1-D batch grid, resident parameter
    #    tables across steps, and the other config branch.
    config2 = 1.0 - config
    out_tiled = categorical_world_2var_forward(
        sample, config2, pA, pB, pAtoB, pBtoA, tile_bs=8)
    out_tiled = jax.block_until_ready(out_tiled)
    ref2 = _reference_logprob(sample, config2, pA, pB, pAtoB, pBtoA)
    np.testing.assert_allclose(np.asarray(out_tiled), np.asarray(ref2),
                               rtol=1e-5, atol=1e-5)

    print("KERNEL_OK")
</pallas_src>

<mosaic_0001>
module attributes {stable_mosaic.version = 11 : i64} {
  func.func @_tables_kernel(%arg0: memref<1xf32, #tpu.memory_space<smem>>, %arg1: memref<2x16xf32, #tpu.memory_space<vmem>>, %arg2: memref<16x16xf32, #tpu.memory_space<vmem>>, %arg3: memref<16x16xf32, #tpu.memory_space<vmem>>, %arg4: memref<1x32xf32, #tpu.memory_space<vmem>>, %arg5: memref<32x32xf32, #tpu.memory_space<vmem>>) attributes {dimension_semantics = [], scalar_prefetch = 0 : i64, scratch_operands = 0 : i64, tpu.core_type = #tpu.core_type<tc>} {
    %c0 = arith.constant 0 : index
    %0 = memref.load %arg0[%c0] : memref<1xf32, #tpu.memory_space<smem>>
    %c0_0 = arith.constant 0 : index
    %c0_1 = arith.constant 0 : index
    %1 = vector.load %arg1[%c0_0, %c0_1] : memref<2x16xf32, #tpu.memory_space<vmem>>, vector<2x16xf32>
    %cst = arith.constant dense<0xFF800000> : vector<2xf32>
    %2 = vector.multi_reduction <maximumf>, %1, %cst [1] : vector<2x16xf32> to vector<2xf32>
    %3 = vector.shape_cast %2 : vector<2xf32> to vector<2x1xf32>
    %4 = vector.broadcast %3 : vector<2x1xf32> to vector<2x16xf32>
    %5 = arith.subf %1, %4 : vector<2x16xf32>
    %6 = math.exp %5 : vector<2x16xf32>
    %cst_2 = arith.constant dense<0.000000e+00> : vector<2xf32>
    %7 = vector.multi_reduction <add>, %6, %cst_2 [1] : vector<2x16xf32> to vector<2xf32>
    %8 = vector.shape_cast %7 : vector<2xf32> to vector<2x1xf32>
    %9 = math.log %8 : vector<2x1xf32>
    %10 = vector.broadcast %9 : vector<2x1xf32> to vector<2x16xf32>
    %11 = arith.subf %5, %10 : vector<2x16xf32>
    %12 = vector.extract_strided_slice %11 {offsets = [0, 0], sizes = [1, 16], strides = [1, 1]} : vector<2x16xf32> to vector<1x16xf32>
    %13 = vector.broadcast %0 : f32 to vector<1x16xf32>
    %14 = arith.mulf %13, %12 : vector<1x16xf32>
    %c0_3 = arith.constant 0 : index
    %c0_4 = arith.constant 0 : index
    %15 = vector.load %arg4[%c0_3, %c0_4] : memref<1x32xf32, #tpu.memory_space<vmem>>, vector<1x16xf32>
    tpu.vector_store %arg4[%c0_3, %c0_4], %14 {strides = array<i32>} : memref<1x32xf32, #tpu.memory_space<vmem>>, vector<1x16xf32>,
    %cst_5 = arith.constant 1.000000e+00 : f32
    %16 = arith.subf %cst_5, %0 : f32
    %17 = vector.extract_strided_slice %11 {offsets = [1, 0], sizes = [1, 16], strides = [1, 1]} : vector<2x16xf32> to vector<1x16xf32>
    %18 = vector.broadcast %16 : f32 to vector<1x16xf32>
    %19 = arith.mulf %18, %17 : vector<1x16xf32>
    %c0_6 = arith.constant 0 : index
    %c16 = arith.constant 16 : index
    %20 = vector.load %arg4[%c0_6, %c16] : memref<1x32xf32, #tpu.memory_space<vmem>>, vector<1x16xf32>
    tpu.vector_store %arg4[%c0_6, %c16], %19 {strides = array<i32>} : memref<1x32xf32, #tpu.memory_space<vmem>>, vector<1x16xf32>,
    %cst_7 = arith.constant 0.000000e+00 : f32
    %21 = vector.broadcast %cst_7 : f32 to vector<32x32xf32>
    %c0_8 = arith.constant 0 : index
    %c0_9 = arith.constant 0 : index
    %22 = vector.load %arg5[%c0_8, %c0_9] : memref<32x32xf32, #tpu.memory_space<vmem>>, vector<32x32xf32>
    tpu.vector_store %arg5[%c0_8, %c0_9], %21 {strides = array<i32>} : memref<32x32xf32, #tpu.memory_space<vmem>>, vector<32x32xf32>,
    %c0_10 = arith.constant 0 : index
    %c0_11 = arith.constant 0 : index
    %23 = vector.load %arg2[%c0_10, %c0_11] : memref<16x16xf32, #tpu.memory_space<vmem>>, vector<16x16xf32>
    %cst_12 = arith.constant dense<0xFF800000> : vector<16xf32>
    %24 = vector.multi_reduction <maximumf>, %23, %cst_12 [1] : vector<16x16xf32> to vector<16xf32>
    %25 = vector.shape_cast %24 : vector<16xf32> to vector<16x1xf32>
    %26 = vector.broadcast %25 : vector<16x1xf32> to vector<16x16xf32>
    %27 = arith.subf %23, %26 : vector<16x16xf32>
    %28 = math.exp %27 : vector<16x16xf32>
    %cst_13 = arith.constant dense<0.000000e+00> : vector<16xf32>
    %29 = vector.multi_reduction <add>, %28, %cst_13 [1] : vector<16x16xf32> to vector<16xf32>
    %30 = vector.shape_cast %29 : vector<16xf32> to vector<16x1xf32>
    %31 = math.log %30 : vector<16x1xf32>
    %32 = vector.broadcast %31 : vector<16x1xf32> to vector<16x16xf32>
    %33 = arith.subf %27, %32 : vector<16x16xf32>
    %34 = vector.broadcast %0 : f32 to vector<16x16xf32>
    %35 = arith.mulf %34, %33 : vector<16x16xf32>
    %c0_14 = arith.constant 0 : index
    %c16_15 = arith.constant 16 : index
    %36 = vector.load %arg5[%c0_14, %c16_15] : memref<32x32xf32, #tpu.memory_space<vmem>>, vector<16x16xf32>
    tpu.vector_store %arg5[%c0_14, %c16_15], %35 {strides = array<i32>} : memref<32x32xf32, #tpu.memory_space<vmem>>, vector<16x16xf32>,
    %cst_16 = arith.constant 1.000000e+00 : f32
    %37 = arith.subf %cst_16, %0 : f32
    %c0_17 = arith.constant 0 : index
    %c0_18 = arith.constant 0 : index
    %38 = vector.load %arg3[%c0_17, %c0_18] : memref<16x16xf32, #tpu.memory_space<vmem>>, vector<16x16xf32>
    %cst_19 = arith.constant dense<0xFF800000> : vector<16xf32>
    %39 = vector.multi_reduction <maximumf>, %38, %cst_19 [1] : vector<16x16xf32> to vector<16xf32>
    %40 = vector.shape_cast %39 : vector<16xf32> to vector<16x1xf32>
    %41 = vector.broadcast %40 : vector<16x1xf32> to vector<16x16xf32>
    %42 = arith.subf %38, %41 : vector<16x16xf32>
    %43 = math.exp %42 : vector<16x16xf32>
    %cst_20 = arith.constant dense<0.000000e+00> : vector<16xf32>
    %44 = vector.multi_reduction <add>, %43, %cst_20 [1] : vector<16x16xf32> to vector<16xf32>
    %45 = vector.shape_cast %44 : vector<16xf32> to vector<16x1xf32>
    %46 = math.log %45 : vector<16x1xf32>
    %47 = vector.broadcast %46 : vector<16x1xf32> to vector<16x16xf32>
    %48 = arith.subf %42, %47 : vector<16x16xf32>
    %49 = vector.broadcast %37 : f32 to vector<16x16xf32>
    %50 = arith.mulf %49, %48 : vector<16x16xf32>
    %c16_21 = arith.constant 16 : index
    %c0_22 = arith.constant 0 : index
    %51 = vector.load %arg5[%c16_21, %c0_22] : memref<32x32xf32, #tpu.memory_space<vmem>>, vector<16x16xf32>
    tpu.vector_store %arg5[%c16_21, %c0_22], %50 {strides = array<i32>} : memref<32x32xf32, #tpu.memory_space<vmem>>, vector<16x16xf32>,
    return
  }
}

module attributes {stable_mosaic.version = 11 : i64} {
  func.func @_logprob_kernel(%arg0: i32, %arg1: memref<32x32xf32, #tpu.memory_space<vmem>>, %arg2: memref<1x32xf32, #tpu.memory_space<vmem>>, %arg3: memref<32x32xf32, #tpu.memory_space<vmem>>, %arg4: memref<32x2xf32, #tpu.memory_space<vmem>>) attributes {dimension_semantics = [#tpu.dimension_semantics<parallel>], iteration_bounds = array<i64: 1>, scalar_prefetch = 0 : i64, scratch_operands = 0 : i64, tpu.core_type = #tpu.core_type<tc>, window_params = [{transform_indices = @transform_0, window_bounds = array<i64: 32, 32>}, {pipeline_mode = #tpu.pipeline_mode<synchronous>, transform_indices = @transform_1, window_bounds = array<i64: 1, 32>}, {pipeline_mode = #tpu.pipeline_mode<synchronous>, transform_indices = @transform_2, window_bounds = array<i64: 32, 32>}, {transform_indices = @transform_3, window_bounds = array<i64: 32, 2>}]} {
    %c0 = arith.constant 0 : index
    %c0_0 = arith.constant 0 : index
    %0 = vector.load %arg1[%c0, %c0_0] : memref<32x32xf32, #tpu.memory_space<vmem>>, vector<32x32xf32>
    %c0_1 = arith.constant 0 : index
    %c0_2 = arith.constant 0 : index
    %1 = vector.load %arg2[%c0_1, %c0_2] : memref<1x32xf32, #tpu.memory_space<vmem>>, vector<1x32xf32>
    %2 = vector.broadcast %1 : vector<1x32xf32> to vector<32x32xf32>
    %3 = arith.mulf %0, %2 : vector<32x32xf32>
    %cst = arith.constant dense<0.000000e+00> : vector<32xf32>
    %4 = vector.multi_reduction <add>, %3, %cst [1] : vector<32x32xf32> to vector<32xf32>
    %5 = vector.shape_cast %4 : vector<32xf32> to vector<32x1xf32>
    %c0_3 = arith.constant 0 : index
    %c0_4 = arith.constant 0 : index
    %6 = vector.load %arg4[%c0_3, %c0_4] : memref<32x2xf32, #tpu.memory_space<vmem>>, vector<32x1xf32>
    tpu.vector_store %arg4[%c0_3, %c0_4], %5 {strides = array<i32>} : memref<32x2xf32, #tpu.memory_space<vmem>>, vector<32x1xf32>,
    %c0_5 = arith.constant 0 : index
    %c0_6 = arith.constant 0 : index
    %7 = vector.load %arg3[%c0_5, %c0_6] : memref<32x32xf32, #tpu.memory_space<vmem>>, vector<32x32xf32>
    %cst_7 = arith.constant dense<0.000000e+00> : vector<32x32xf32>
    %8 = tpu.matmul %0, %7, %cst_7 {dimension_numbers = #tpu.dot_dimension_numbers<[1], [0], [0], [1], [0, 0, 1, 1], [], []>} : vector<32x32xf32>, vector<32x32xf32>, vector<32x32xf32> -> vector<32x32xf32>
    %9 = arith.mulf %8, %0 : vector<32x32xf32>
    %cst_8 = arith.constant dense<0.000000e+00> : vector<32xf32>
    %10 = vector.multi_reduction <add>, %9, %cst_8 [1] : vector<32x32xf32> to vector<32xf32>
    %11 = vector.shape_cast %10 : vector<32xf32> to vector<32x1xf32>
    %c0_9 = arith.constant 0 : index
    %c1 = arith.constant 1 : index
    %12 = vector.load %arg4[%c0_9, %c1] : memref<32x2xf32, #tpu.memory_space<vmem>>, vector<32x1xf32>
    tpu.vector_store %arg4[%c0_9, %c1], %11 {strides = array<i32>} : memref<32x2xf32, #tpu.memory_space<vmem>>, vector<32x1xf32>,
    return
  }
  func.func @transform_0(%arg0: i32) -> (i32, i32) {
    %c0_i32 = arith.constant 0 : i32
    %c0_i32_0 = arith.constant 0 : i32
    return %arg0, %c0_i32 : i32, i32
  }
  func.func @transform_1(%arg0: i32) -> (i32, i32) {
    %c0_i32 = arith.constant 0 : i32
    %c0_i32_0 = arith.constant 0 : i32
    %c0_i32_1 = arith.constant 0 : i32
    return %c0_i32, %c0_i32_0 : i32, i32
  }
  func.func @transform_2(%arg0: i32) -> (i32, i32) {
    %c0_i32 = arith.constant 0 : i32
    %c0_i32_0 = arith.constant 0 : i32
    %c0_i32_1 = arith.constant 0 : i32
    return %c0_i32, %c0_i32_0 : i32, i32
  }
  func.func @transform_3(%arg0: i32) -> (i32, i32) {
    %c0_i32 = arith.constant 0 : i32
    %c0_i32_0 = arith.constant 0 : i32
    return %arg0, %c0_i32 : i32, i32
  }
}

</mosaic_0001>

<bundles_post_ra>
// kernel: categorical_world_2var_forward.3
= control target key start
LH: loop header
LB: loop body
LE: loop exit
PB: predicated region body
PF: predicated region fallthrough
CT: control target
= control target key end

     0   :  { %vm29_vm0 = vcmask 261120   ;;  %vm42_vm1 = vcmask 7168   ;;  %vm164_vm2 = vcmask 15368   ;;  %s299_s2 = inlined_call_operand.vmem [shape: f32[32,32], index: 2, kind: input, shape index: {}]   ;;  %s300_s0 = inlined_call_operand.vmem [shape: f32[32,32], index: 0, kind: input, shape index: {}]   ;;  %s301_s1 = inlined_call_operand.vmem [shape: f32[1,32], index: 1, kind: input, shape index: {}]   ;;  %s302_s3 = inlined_call_operand.vmem [shape: f32[32,2], index: 3, kind: output, shape index: {}]  }
   0x1   :  { %v47_v0 = vld [vmem:[%s299_s2] sm:$0xff]  ;;  %v48_v1 = vld [vmem:[%s299_s2 + $0x8] sm:$0xff]  ;;  %v49_v2 = vld [vmem:[%s299_s2 + $0x10] sm:$0xff] }
   0x2   :  { %v200_v3 = vpack.c.bf16 %v48_v1, %v47_v0  ;;  %v50_v4 = vld [vmem:[%s299_s2 + $0x18] sm:$0xff]  ;;  %v14_v5 = vld [vmem:[%s300_s0] sm:$0xff]  ;;  %v16_v7 = vld [vmem:[%s300_s0 + $0x10] sm:$0xff] }
   0x3   :  { %v204_v6 = vpack.c.bf16 %v50_v4, %v49_v2  ;;  %194 = vmatprep.mubr.msk.f32.mxu0 %vm29_vm0, %v14_v5  ;;  %v17_v8 = vld [vmem:[%s300_s0 + $0x18] sm:$0xff]  ;;  %v173_v9 = vld [vmem:[%s301_s1] ss:$0 sm:$0xff]  ;;  %197 = vmatprep.mubr.msk.f32.mxu1 %vm29_vm0, %v16_v7  ;;  %v15_v16 = vld [vmem:[%s300_s0 + $0x8] sm:$0xff] }
   0x4   :  { %201 = vmatprep.subr.bf16.mxu0 %v200_v3  ;;  %208 = vmatprep.subr.bf16.mxu1 %v200_v3  ;;  %v27_v10 = vmul.f32 %v173_v9, %v16_v7  ;;  %v25_v11 = vmul.f32 %v173_v9, %v14_v5  ;;  %v28_v12 = vmul.f32 %v173_v9, %v17_v8 }
   0x5   :  { %203 = vmatpush3.bf16.msra.mxu0 %v200_v3  ;;  %210 = vmatpush3.bf16.msra.mxu1 %v200_v3  ;;  %v26_v17 = vmul.f32 %v173_v9, %v15_v16 }
   0x6   :  { %205 = vmatprep.subr.bf16.mxu0 %v204_v6  ;;  %209 = vmatprep.subr.bf16.mxu1 %v204_v6  ;;  %v36_v13 = vsel %vm29_vm0, %v27_v10, 0.0  ;;  %v30_v14 = vsel %vm29_vm0, %v25_v11, 0.0  ;;  %v39_v15 = vsel %vm29_vm0, %v28_v12, 0.0 }
   0x7   :  { %37 = vadd.xlane.f32.xlu1 %v36_v13  ;;  %31 = vadd.xlane.f32.xlu0 %v30_v14  ;;  %v33_v18 = vsel %vm29_vm0, %v26_v17, 0.0 }
   0x9   :  { %207 = vmatpush3.bf16.msra.mxu0 %v204_v6  ;;  %211 = vmatpush3.bf16.msra.mxu1 %v204_v6 }
   0xb   :  { %40 = vadd.xlane.f32.xlu1 %v39_v15  ;;  %34 = vadd.xlane.f32.xlu0 %v33_v18 }
   0xc   :  { %195 = vmatmul.mubr.msk.f32.vlgmr.msra.gmra.mrb[0].mxu0 %vm29_vm0, %v15_v16  ;;  %198 = vmatmul.mubr.msk.f32.vlgmr.msra.gmra.mrb[0].mxu1 %vm29_vm0, %v17_v8 }
  0x94   :  { %v38_v19 = vpop.xlane.xlu1 %37  ;;  %v32_v20 = vpop.xlane.xlu0 %31 }
  0x95   :  { %45 = vst.msk [vmem:[%s302_s3 + $0x10] sm:$0xff] %vm42_vm1, %v38_v19  ;;  %43 = vst.msk [vmem:[%s302_s3] sm:$0xff] %vm42_vm1, %v32_v20 }
  0x98   :  { %v41_v21 = vpop.xlane.xlu1 %40  ;;  %v35_v34 = vpop.xlane.xlu0 %34 }
  0x99   :  { %46 = vst.msk [vmem:[%s302_s3 + $0x18] sm:$0xff] %vm42_vm1, %v41_v21  ;;  %44 = vst.msk [vmem:[%s302_s3 + $0x8] sm:$0xff] %vm42_vm1, %v35_v34 }
  0xdf   :  { %v196_v22 = vpop.f32.mrb[0].mxu0  ;;  %v199_v23 = vpop.f32.mrb[0].mxu1 }
  0xe0   :  { %v149_v24 = vmul.f32 %v196_v22, %v15_v16  ;;  %v129_v25 = vpop.f32.mrb[1].mxu0  ;;  %v151_v26 = vmul.f32 %v199_v23, %v17_v8  ;;  %v139_v27 = vpop.f32.mrb[1].mxu1 }
  0xe1   :  { %v148_v28 = vmul.f32 %v129_v25, %v14_v5  ;;  %v150_v29 = vmul.f32 %v139_v27, %v16_v7 }
  0xe2   :  { %v155_v30 = vsel %vm29_vm0, %v149_v24, 0.0  ;;  %v161_v32 = vsel %vm29_vm0, %v151_v26, 0.0 }
  0xe3   :  { %156 = vadd.xlane.f32.xlu1 %v155_v30  ;;  %v152_v31 = vsel %vm29_vm0, %v148_v28, 0.0  ;;  %v158_v33 = vsel %vm29_vm0, %v150_v29, 0.0 }
  0xe4   :  { %153 = vadd.xlane.f32.xlu0 %v152_v31 }
  0xe7   :  { %162 = vadd.xlane.f32.xlu1 %v161_v32 }
  0xe8   :  { %159 = vadd.xlane.f32.xlu0 %v158_v33 }
 0x170   :  { %v157_v35 = vpop.xlane.xlu1 %156 }
 0x171   :  { %166 = vst.msk [vmem:[%s302_s3 + $0x8] sm:$0xff] %vm164_vm2, %v157_v35  ;;  %v154_v36 = vpop.xlane.xlu0 %153 }
 0x172   :  { %165 = vst.msk [vmem:[%s302_s3] sm:$0xff] %vm164_vm2, %v154_v36 }
 0x174   :  { %v163_v37 = vpop.xlane.xlu1 %162 }
 0x175   :  { %168 = vst.msk [vmem:[%s302_s3 + $0x18] sm:$0xff] %vm164_vm2, %v163_v37  ;;  %v160_v38 = vpop.xlane.xlu0 %159 }
 0x176   :  { %167 = vst.msk [vmem:[%s302_s3 + $0x10] sm:$0xff] %vm164_vm2, %v160_v38 }

// kernel: categorical_world_2var_forward.2
= control target key start
LH: loop header
LB: loop body
LE: loop exit
PB: predicated region body
PF: predicated region fallthrough
CT: control target
= control target key end

     0   :  { %vm22_vm0 = vcmask 123904   ;;  %vm55_vm1 = vcmask 130048   ;;  %vm48_vm2 = vcmask 261120   ;;  %v153_v35 = vmov 0.0   ;;  %s154_s13 = smov 16   ;;  %s264_s1 = inlined_call_operand.vmem [shape: f32[2,16], index: 1, kind: input, shape index: {}]   ;;  %s265_s2 = inlined_call_operand.vmem [shape: f32[16,16], index: 2, kind: input, shape index: {}]   ;;  %s266_s3 = inlined_call_operand.vmem [shape: f32[16,16], index: 3, kind: input, shape index: {}]   ;;  %s267_s5 = inlined_call_operand.vmem [shape: f32[32,32], index: 5, kind: output, shape index: {1}]   ;;  %s268_s0 = inlined_call_operand.<no memory space> [shape: f32[1], index: 0, kind: input, shape index: {}]   ;;  %s269_s4 = inlined_call_operand.vmem [shape: f32[1,32], index: 4, kind: output, shape index: {0}]  }
   0x1   :  { %v21_v0 = vld [vmem:[%s264_s1] sm:$0x3]  ;;  %v54_v1 = vld [vmem:[%s265_s2 + $0x8] sm:$0xff]  ;;  %49 = vst.msk [vmem:[%s267_s5] sm:$0xff] %vm48_vm2, %v153_v35  ;;  %51 = vst.msk [vmem:[%s267_s5 + $0x10] sm:$0xff] %vm48_vm2, %v153_v35  ;;  %s39_s10 = ssub.f32 1.0, %s268_s0 }
   0x2   :  { %v53_v2 = vld [vmem:[%s265_s2] sm:$0xff]  ;;  %v23_v3 = vsel %vm22_vm0, %v21_v0, -inf  ;;  %v59_v4 = vsel %vm55_vm1, %v54_v1, -inf  ;;  %v94_v8 = vld [vmem:[%s266_s3 + $0x8] sm:$0xff]  ;;  %52 = vst.msk [vmem:[%s267_s5 + $0x18] sm:$0xff] %vm48_vm2, %v153_v35  ;;  %50 = vst.msk [vmem:[%s267_s5 + $0x8] sm:$0xff] %vm48_vm2, %v153_v35 }
   0x3   :  { %v93_v5 = vld [vmem:[%s266_s3] sm:$0xff]  ;;  %24 = vmax.xlane.f32.xlu0 %v23_v3  ;;  %60 = vmax.xlane.f32.xlu1 %v59_v4  ;;  %v56_v6 = vsel %vm55_vm1, %v53_v2, -inf  ;;  %v98_v9 = vsel %vm55_vm1, %v94_v8, -inf  ;;  %v40_v43 = vstv %s39_s10  ;;  %v35_v44 = vstv %s268_s0 }
   0x4   :  { %v95_v7 = vsel %vm55_vm1, %v93_v5, -inf  ;;  %vm37_vm3 = vcmask 122880   ;;  %vm46_vm4 = vcmask 255105   ;;  %vm90_vm5 = vcmask 261248  }
   0x7   :  { %57 = vmax.xlane.f32.xlu0 %v56_v6  ;;  %96 = vmax.xlane.f32.xlu1 %v95_v7 }
   0xb   :  { %99 = vmax.xlane.f32.xlu0 %v98_v9 }
  0x90   :  { %v25_v10 = vpop.xlane.xlu0 %24  ;;  %v61_v11 = vpop.xlane.xlu1 %60 }
  0x91   :  { %v26_v12 = vsub.f32 %v21_v0, %v25_v10  ;;  %v205_v13 = vsub.f32 %v54_v1, %v61_v11 }
  0x93   :  { %v27_v14 = vmul.f32 1.442695, %v26_v12  ;;  %v66_v15 = vmul.f32 1.442695, %v205_v13 }
  0x94   :  { %v58_v16 = vpop.xlane.xlu0 %57  ;;  %v97_v17 = vpop.xlane.xlu1 %96 }
  0x95   :  { %133 = vpow2.f32 %v27_v14  ;;  %v208_v18 = vsub.f32 %v53_v2, %v58_v16  ;;  %v210_v19 = vsub.f32 %v93_v5, %v97_v17 }
  0x96   :  { %135 = vpow2.f32 %v66_v15 }
  0x97   :  { %v64_v20 = vmul.f32 1.442695, %v208_v18  ;;  %v103_v21 = vmul.f32 1.442695, %v210_v19 }
  0x98   :  { %v100_v22 = vpop.xlane.xlu0 %99 }
  0x99   :  { %137 = vpow2.f32 %v64_v20  ;;  %v214_v23 = vsub.f32 %v94_v8, %v100_v22 }
  0x9a   :  { %139 = vpow2.f32 %v103_v21 }
  0x9b   :  { %v105_v24 = vmul.f32 1.442695, %v214_v23 }
  0x9d   :  { %141 = vpow2.f32 %v105_v24 }
  0x9f   :  { %v134_v25 = vpop.eup %133 }
  0xa0   :  { %v136_v26 = vpop.eup %135  ;;  %v29_v27 = vsel %vm22_vm0, %v134_v25, 0.0 }
  0xa1   :  { %30 = vadd.xlane.f32.xlu1 %v29_v27  ;;  %v71_v28 = vsel %vm55_vm1, %v136_v26, 0.0 }
  0xa3   :  { %v138_v29 = vpop.eup %137 }
  0xa4   :  { %v140_v30 = vpop.eup %139  ;;  %v68_v31 = vsel %vm55_vm1, %v138_v29, 0.0 }
  0xa5   :  { %72 = vadd.xlane.f32.xlu1 %v71_v28  ;;  %69 = vadd.xlane.f32.xlu0 %v68_v31  ;;  %v107_v32 = vsel %vm55_vm1, %v140_v30, 0.0 }
  0xa7   :  { %v142_v33 = vpop.eup %141 }
  0xa8   :  { %v110_v34 = vsel %vm55_vm1, %v142_v33, 0.0 }
  0xa9   :  { %108 = vadd.xlane.f32.xlu0 %v107_v32  ;;  %111 = vadd.xlane.f32.xlu1 %v110_v34 }
 0x12e   :  { %v31_v36 = vpop.xlane.xlu1 %30 }
 0x12f   :  { %143 = vlog2.f32 %v31_v36 }
 0x132   :  { %v73_v37 = vpop.xlane.xlu1 %72  ;;  %v70_v38 = vpop.xlane.xlu0 %69 }
 0x133   :  { %145 = vlog2.f32 %v73_v37 }
 0x134   :  { %147 = vlog2.f32 %v70_v38 }
 0x136   :  { %v112_v39 = vpop.xlane.xlu1 %111  ;;  %v109_v40 = vpop.xlane.xlu0 %108 }
 0x137   :  { %149 = vlog2.f32 %v112_v39 }
 0x138   :  { %151 = vlog2.f32 %v109_v40 }
 0x139   :  { %v144_v41 = vpop.eup %143 }
 0x13a   :  { %v33_v42 = vmul.f32 0.6931472, %v144_v41 }
 0x13c   :  { %v34_v45 = vsub.f32 %v26_v12, %v33_v42 }
 0x13d   :  { %v146_v46 = vpop.eup %145 }
 0x13e   :  { %v148_v47 = vpop.eup %147  ;;  %v41_v48 = vmul.f32 %v40_v43, %v34_v45  ;;  %v36_v49 = vmul.f32 %v35_v44, %v34_v45  ;;  %v77_v50 = vmul.f32 0.6931472, %v146_v46 }
 0x13f   :  { %v75_v51 = vmul.f32 0.6931472, %v148_v47 }
 0x140   :  { %43 = vrot.lane.b32.xlu0 %v41_v48, %s154_s13  ;;  %38 = vst.msk [vmem:[%s269_s4] sm:$0x1] %vm37_vm3, %v36_v49  ;;  %v79_v56 = vsub.f32 %v205_v13, %v77_v50 }
 0x141   :  { %v150_v52 = vpop.eup %149  ;;  %v78_v53 = vsub.f32 %v208_v18, %v75_v51 }
 0x142   :  { %v152_v54 = vpop.eup %151  ;;  %v116_v55 = vmul.f32 0.6931472, %v150_v52  ;;  %v81_v63 = vmul.f32 %v79_v56, %v35_v44 }
 0x143   :  { %v114_v57 = vmul.f32 0.6931472, %v152_v54  ;;  %v80_v58 = vmul.f32 %v78_v53, %v35_v44 }
 0x144   :  { %v118_v59 = vsub.f32 %v214_v23, %v116_v55 }
 0x145   :  { %v117_v60 = vsub.f32 %v210_v19, %v114_v57  ;;  %84 = vrot.lane.b32.xlu1 %v80_v58, %s154_s13 }
 0x146   :  { %v120_v61 = vmul.f32 %v118_v59, %v40_v43 }
 0x147   :  { %v119_v62 = vmul.f32 %v117_v60, %v40_v43 }
 0x148   :  { %122 = vst.msk [vmem:[%s267_s5 + $0x18] sm:$0xff] %vm55_vm1, %v120_v61 }
 0x149   :  { %86 = vrot.lane.b32.xlu1 %v81_v63, %s154_s13  ;;  %121 = vst.msk [vmem:[%s267_s5 + $0x10] sm:$0xff] %vm55_vm1, %v119_v62 }
 0x1b2   :  { %v44_v0 = vpop.permute.xlu0 %43 }
 0x1b3   :  { %47 = vst.msk [vmem:[%s269_s4 - $0x1] sm:$0x2] %vm46_vm4, %v44_v0 }
 0x1b7   :  { %v85_v1 = vpop.permute.xlu1 %84 }
 0x1b8   :  { %91 = vst.msk [vmem:[%s267_s5] sm:$0xff] %vm90_vm5, %v85_v1 }
 0x1bb   :  { %v87_v2 = vpop.permute.xlu1 %86 }
 0x1bc   :  { %92 = vst.msk [vmem:[%s267_s5 + $0x8] sm:$0xff] %vm90_vm5, %v87_v2 }

</bundles_post_ra>
